<compile_context>
chip_gen: v7x
topology: tpu7x:2x2x1
jax: 0.10.0
libtpu: 0.0.40
codegen_flags: <defaults>
</compile_context>

<pallas_src>
import functools

import numpy as np

import jax
import jax.numpy as jnp
from jax.experimental import pallas as pl
from jax.experimental.pallas import tpu as pltpu

IGNORE_INDEX = -100
GAMMA = 2.0          # the module uses gamma=2 for every head
C_PAD = 128          # class axis padded to one full lane width

TASKS = ("age", "race", "masked", "skintone", "emotion", "gender")
ALPHAS = {
    "age":      (0.1, 0.1, 0.3, 0.15, 0.15, 0.2),
    "race":     (0.15, 0.15, 0.7),
    "masked":   (0.85, 0.15),
    "skintone": (0.4, 0.15, 0.3, 0.15),
    "emotion":  (0.15, 0.2, 0.2, 0.1, 0.1, 0.1, 0.15),
    "gender":   (0.4, 0.6),
}
NUM_CLASSES = {t: len(ALPHAS[t]) for t in TASKS}
OFFSETS = {}
_off = 0
for _t in TASKS:
    OFFSETS[_t] = _off
    _off += NUM_CLASSES[_t]
C_TOTAL = _off                 # 24
NUM_TASKS = len(TASKS)         # 6

# concatenated per-class alpha vector and the task-segment broadcast matrix
# (SEG[l, l'] = 1 iff lanes l and l' belong to the same task)
_ALPHA_NP = np.zeros((1, C_PAD), np.float32)
_SEG_NP = np.zeros((C_PAD, C_PAD), np.float32)
for _t in TASKS:
    _o, _c = OFFSETS[_t], NUM_CLASSES[_t]
    _ALPHA_NP[0, _o:_o + _c] = np.asarray(ALPHAS[_t], np.float32)
    _SEG_NP[_o:_o + _c, _o:_o + _c] = 1.0


# --------------------------------------------------------------------------- #
# Generation-aware VMEM budgets
# --------------------------------------------------------------------------- #
def _vmem_limit_bytes():
    """~0.75 x physical VMEM, capped at 100 MiB (v7x: 64 MiB/TC -> ~48 MiB;
    v5e/v6e: 128 MiB -> ~96-100 MiB). Conservative 64 MiB fallback."""
    cap = 64 * 1024 * 1024
    try:
        info = pltpu.get_tpu_info()
        c = getattr(info, "vmem_capacity_bytes", None)
        if c:
            cap = int(c)
    except Exception:
        pass
    return min((cap * 3) // 4, 100 * 1024 * 1024)


_VMEM_LIMIT = _vmem_limit_bytes()
_TILE_BUDGET = int(_VMEM_LIMIT * 0.65)     # share of the limit used for tile sizing


def _pick_tile(n, cap):
    """Largest tile <= cap that is either the full extent or a multiple of 8
    dividing n (TPU sublane constraint for blocked dims)."""
    if n <= cap:
        return n
    t = (cap // 8) * 8
    while t >= 8:
        if n % t == 0:
            return t
        t -= 8
    return n


# --------------------------------------------------------------------------- #
# Fused kernel: seq-mean accumulation + lane-dense head matmul + focal partials
# --------------------------------------------------------------------------- #
def _fused_kernel(x_ref, w_ref, b_ref, alpha_ref, seg_ref, h_ref,
                  heads_ref, loss_ref, acc_ref, *, inv_s):
    # grid = (batch tiles [parallel], packed-seq tiles [arbitrary, innermost])
    s = pl.program_id(1)

    @pl.when(s == 0)
    def _():
        acc_ref[...] = jnp.zeros_like(acc_ref)

    # f32 sequence-sum of this (TB, TS, Dk) tile (x may stream as bf16)
    acc_ref[...] += jnp.sum(x_ref[...].astype(jnp.float32), axis=1)

    @pl.when(s == pl.num_programs(1) - 1)
    def _():
        # mean-before-matmul; the k-times-replicated weight folds packed tokens
        z = (jnp.dot(acc_ref[...], w_ref[...].astype(jnp.float32),
                     preferred_element_type=jnp.float32) * inv_s + b_ref[...])
        heads_ref[...] = z                                    # (TB, 128) f32

        # ---------- fused focal-loss partials (once per batch tile) ----------
        tb = z.shape[0]
        col = jax.lax.broadcasted_iota(jnp.int32, (tb, C_PAD), 1)
        real = col < C_TOTAL
        neg_big = jnp.float32(-1e30)

        # per-task row max broadcast back to that task's lanes (6 cheap XLU maxes)
        maxmap = jnp.zeros_like(z)
        for t in TASKS:
            off, c = OFFSETS[t], NUM_CLASSES[t]
            in_t = (col >= off) & (col < off + c)
            m_t = jnp.max(jnp.where(in_t, z, neg_big), axis=-1, keepdims=True)
            maxmap = jnp.where(in_t, m_t, maxmap)

        # ONE full-width exp (EUP); per-task sum-exp broadcast on the MXU
        e = jnp.exp(jnp.where(real, z - maxmap, neg_big))     # pad lanes -> 0
        se = jnp.dot(e, seg_ref[...], preferred_element_type=jnp.float32)
        se = jnp.where(real, se, 1.0)                         # keep log finite
        logp = z - (jnp.log(se) + maxmap)                     # per-task log-softmax
        pt = e / se                                           # softmax prob per lane

        # h: label-lane one-hot (0 on ignored rows) -> CE gather + valid counts
        h = h_ref[...]
        d = 1.0 - pt
        contrib = h * alpha_ref[...] * (-logp) * d * d        # alpha_y * CE * (1-pt)^2

        csum = jnp.sum(contrib, axis=0, keepdims=True)        # (1,128) loss sums
        cnt = jnp.sum(h, axis=0, keepdims=True)               # (1,128) valid counts
        rowi = jax.lax.broadcasted_iota(jnp.int32, (8, C_PAD), 0)
        loss_ref[...] = (jnp.where(rowi == 0, csum, 0.0)
                         + jnp.where(rowi == 1, cnt, 0.0))


def _fused_call(x, w_rep, b_pad, alpha_vec, seg_mat, h_mat, *, inv_s,
                batch_tile=None, seq_tile=None):
    B, Sp, Dk = x.shape
    itemsize = jnp.dtype(x.dtype).itemsize

    if batch_tile is None:
        cap_b = 128
        if B >= 16:
            # guarantee >= 2 steps on the "parallel" axis (v7x dual TensorCore)
            cap_b = min(cap_b, max(8, (B // 2) // 8 * 8))
        batch_tile = _pick_tile(B, cap_b)
    if seq_tile is None:
        # fit the double-buffered (TB, TS, Dk) input block inside the budget,
        # leaving room for the resident weight / seg / acc / outputs
        overhead = 4 * (Dk * C_PAD + batch_tile * Dk + C_PAD * C_PAD
                        + 6 * batch_tile * C_PAD)
        x_budget = max(_TILE_BUDGET - overhead, 2 * 1024 * 1024)
        ts_cap = max(8, x_budget // (2 * batch_tile * Dk * itemsize))
        seq_tile = _pick_tile(Sp, ts_cap)
    assert B % batch_tile == 0 and Sp % seq_tile == 0

    n_btiles = B // batch_tile
    grid = (n_btiles, Sp // seq_tile)
    kernel = functools.partial(_fused_kernel, inv_s=inv_s)

    return pl.pallas_call(
        kernel,
        out_shape=(jax.ShapeDtypeStruct((B, C_PAD), jnp.float32),
                   jax.ShapeDtypeStruct((n_btiles * 8, C_PAD), jnp.float32)),
        grid_spec=pltpu.PrefetchScalarGridSpec(
            num_scalar_prefetch=0,
            grid=grid,
            in_specs=[
                pl.BlockSpec((batch_tile, seq_tile, Dk), lambda b, s: (b, s, 0)),
                pl.BlockSpec((Dk, C_PAD), lambda b, s: (0, 0)),
                pl.BlockSpec((1, C_PAD), lambda b, s: (0, 0)),
                pl.BlockSpec((1, C_PAD), lambda b, s: (0, 0)),
                pl.BlockSpec((C_PAD, C_PAD), lambda b, s: (0, 0)),
                pl.BlockSpec((batch_tile, C_PAD), lambda b, s: (b, 0)),
            ],
            out_specs=[
                pl.BlockSpec((batch_tile, C_PAD), lambda b, s: (b, 0)),
                pl.BlockSpec((8, C_PAD), lambda b, s: (b, 0)),
            ],
            scratch_shapes=[pltpu.VMEM((batch_tile, Dk), jnp.float32)],
        ),
        compiler_params=pltpu.CompilerParams(
            dimension_semantics=("parallel", "arbitrary"),
            vmem_limit_bytes=_VMEM_LIMIT,
        ),
    )(x, w_rep, b_pad, alpha_vec, seg_mat, h_mat)


# --------------------------------------------------------------------------- #
# Parameters / host-side glue
# --------------------------------------------------------------------------- #
def init_params(key, intermediate_dims):
    kw, kb = jax.random.split(key)
    w = jax.random.normal(kw, (intermediate_dims, C_TOTAL), jnp.float32) * 0.02
    b = jax.random.normal(kb, (C_TOTAL,), jnp.float32) * 0.02
    return w, b


def pack_factor(seq_len, feat_dim):
    """Tokens packed per 128-lane row so the seq-sum stays lane-dense."""
    if feat_dim < 128 and 128 % feat_dim == 0 and seq_len % (128 // feat_dim) == 0:
        return 128 // feat_dim
    return 1


def prepare_params(params, pack_k=1):
    """Pad the concatenated head weight to 128 class lanes and replicate it
    pack_k times along the feature axis so the packed-token fold is done by the
    MXU.  Weights stay f32: the (Dk,128) block is tiny and VMEM-resident, and
    f32 keeps the heads bit-accurate (flip to bf16 for the max MXU rate)."""
    w, b = params
    d = w.shape[0]
    w_pad = jnp.zeros((d, C_PAD), jnp.float32).at[:, :C_TOTAL].set(w.astype(jnp.float32))
    w_rep = jnp.tile(w_pad, (pack_k, 1)) if pack_k > 1 else w_pad
    b_pad = jnp.zeros((1, C_PAD), jnp.float32).at[0, :C_TOTAL].set(b.astype(jnp.float32))
    return w_rep, b_pad


def labels_to_onehot(labels):
    """(B,128) f32 map with a 1 at each task's label lane for valid rows."""
    B = labels[TASKS[0]].shape[0]
    H = jnp.zeros((B, C_PAD), jnp.float32)
    for t in TASKS:
        y = labels[t].astype(jnp.int32)
        valid = (y != IGNORE_INDEX) & (y >= 0) & (y < NUM_CLASSES[t])
        lane = OFFSETS[t] + jnp.clip(y, 0, NUM_CLASSES[t] - 1)
        H = H + jnp.where(valid[:, None],
                          jax.nn.one_hot(lane, C_PAD, dtype=jnp.float32), 0.0)
    return H


def multi_task_forward(encoded_feature, w_rep, b_pad, labels=None,
                       *, batch_tile=None, seq_tile=None):
    B, S, D = encoded_feature.shape
    Dk = w_rep.shape[0]
    k = Dk // D
    assert k * D == Dk and S % k == 0, "w_rep pack factor incompatible with input"
    x = encoded_feature.reshape(B, S // k, Dk)      # free contiguous reshape

    h_mat = labels_to_onehot(labels) if labels is not None \
        else jnp.zeros((B, C_PAD), jnp.float32)

    heads, partials = _fused_call(
        x, w_rep, b_pad, jnp.asarray(_ALPHA_NP), jnp.asarray(_SEG_NP), h_mat,
        inv_s=1.0 / S, batch_tile=batch_tile, seq_tile=seq_tile)

    logits = {f"head_{t}": heads[:, OFFSETS[t]:OFFSETS[t] + NUM_CLASSES[t]]
              for t in TASKS}
    if labels is None:
        return logits

    # tiny cross-batch-tile reduction + normalization (matches FocalLoss:
    # mean over non-ignored rows; exactly 0 when no valid rows)
    p = partials.reshape(-1, 8, C_PAD).sum(axis=0)
    csum, cnt = p[0], p[1]
    losses = {}
    total = jnp.float32(0.0)
    for t in TASKS:
        sl = slice(OFFSETS[t], OFFSETS[t] + NUM_CLASSES[t])
        n = jnp.maximum(jnp.sum(cnt[sl]), 1.0)
        l = jnp.sum(csum[sl]) / n
        losses[f"loss_{t}"] = l
        total = total + l
    losses["loss_total"] = total
    return logits, losses


# --------------------------------------------------------------------------- #
# Pure-JAX reference (original op order: per-token linear, then mean over S)
# --------------------------------------------------------------------------- #
def _reference_forward(x, params, labels):
    w, b = params
    z_tok = jnp.einsum("bsd,dc->bsc", x, w) + b
    heads = jnp.mean(z_tok, axis=1)
    logits = {f"head_{t}": heads[:, OFFSETS[t]:OFFSETS[t] + NUM_CLASSES[t]]
              for t in TASKS}

    losses = {}
    total = jnp.float32(0.0)
    for t in TASKS:
        lg = logits[f"head_{t}"]
        y = labels[t]
        a = jnp.asarray(ALPHAS[t], jnp.float32)
        mask = y != IGNORE_INDEX
        y_safe = jnp.where(mask, y, 0)
        log_p = jax.nn.log_softmax(lg, axis=-1)
        log_pt = jnp.take_along_axis(log_p, y_safe[:, None], axis=-1)[:, 0]
        ce = -a[y_safe] * log_pt
        pt = jnp.exp(log_pt)
        focal = (1.0 - pt) ** GAMMA
        per = jnp.where(mask, focal * ce, 0.0)
        cnt = jnp.maximum(jnp.sum(mask.astype(jnp.float32)), 1.0)
        l = jnp.sum(per) / cnt
        losses[f"loss_{t}"] = l
        total = total + l
    losses["loss_total"] = total
    return logits, losses


if __name__ == "__main__":
    B, S, D = 16, 64, 32     # batch, sequence tokens, intermediate_dims

    key = jax.random.PRNGKey(0)
    k_feat, k_params, *k_labels = jax.random.split(key, 2 + NUM_TASKS)

    encoded_f32 = jax.random.normal(k_feat, (B, S, D), jnp.float32)
    encoded_feature = encoded_f32.astype(jnp.bfloat16)   # bf16 HBM streaming

    params = init_params(k_params, D)
    labels = {
        t: jax.random.randint(k, (B,), 0, NUM_CLASSES[t], dtype=jnp.int32)
        for t, k in zip(TASKS, k_labels)
    }
    labels["age"] = labels["age"].at[1].set(IGNORE_INDEX)  # exercise ignore_index

    k_pack = pack_factor(S, D)                 # 4 -> packs 4 tokens per 128-lane row
    w_rep, b_pad = prepare_params(params, k_pack)

    # explicit small tiles -> grid (2 parallel batch steps, 2 reduction steps);
    # defaults auto-size tiles against the generation's VMEM budget.
    fwd = jax.jit(functools.partial(multi_task_forward, batch_tile=8, seq_tile=8))
    logits, losses = fwd(encoded_feature, w_rep, b_pad, labels)
    jax.block_until_ready(losses["loss_total"])
    jax.block_until_ready(logits["head_age"])

    # reference consumes the same bf16-rounded features so only kernel error is compared
    ref_logits, ref_losses = _reference_forward(
        encoded_feature.astype(jnp.float32), params, labels)
    for t in TASKS:
        assert jnp.allclose(logits[f"head_{t}"], ref_logits[f"head_{t}"],
                            rtol=1e-4, atol=1e-4), f"logits mismatch: {t}"
        assert jnp.allclose(losses[f"loss_{t}"], ref_losses[f"loss_{t}"],
                            rtol=1e-4, atol=1e-4), f"loss mismatch: {t}"
    assert jnp.allclose(losses["loss_total"], ref_losses["loss_total"],
                        rtol=1e-4, atol=1e-4), "total loss mismatch"

    print("KERNEL_OK")
</pallas_src>

<mosaic_0001>
module attributes {stable_mosaic.version = 11 : i64} {
  func.func @_fused_kernel(%arg0: i32, %arg1: i32, %arg2: memref<8x8x128xbf16, #tpu.memory_space<vmem>>, %arg3: memref<128x128xf32, #tpu.memory_space<vmem>>, %arg4: memref<1x128xf32, #tpu.memory_space<vmem>>, %arg5: memref<1x128xf32, #tpu.memory_space<vmem>>, %arg6: memref<128x128xf32, #tpu.memory_space<vmem>>, %arg7: memref<8x128xf32, #tpu.memory_space<vmem>>, %arg8: memref<8x128xf32, #tpu.memory_space<vmem>>, %arg9: memref<8x128xf32, #tpu.memory_space<vmem>>, %arg10: memref<8x128xf32, #tpu.memory_space<vmem>>) attributes {dimension_semantics = [#tpu.dimension_semantics<parallel>, #tpu.dimension_semantics<arbitrary>], iteration_bounds = array<i64: 2, 2>, scalar_prefetch = 0 : i64, scratch_operands = 1 : i64, tpu.core_type = #tpu.core_type<tc>, window_params = [{transform_indices = @transform_0, window_bounds = array<i64: 8, 8, 128>}, {pipeline_mode = #tpu.pipeline_mode<synchronous>, transform_indices = @transform_1, window_bounds = array<i64: 128, 128>}, {pipeline_mode = #tpu.pipeline_mode<synchronous>, transform_indices = @transform_2, window_bounds = array<i64: 1, 128>}, {pipeline_mode = #tpu.pipeline_mode<synchronous>, transform_indices = @transform_3, window_bounds = array<i64: 1, 128>}, {pipeline_mode = #tpu.pipeline_mode<synchronous>, transform_indices = @transform_4, window_bounds = array<i64: 128, 128>}, {transform_indices = @transform_5, window_bounds = array<i64: 8, 128>}, {transform_indices = @transform_6, window_bounds = array<i64: 8, 128>}, {transform_indices = @transform_7, window_bounds = array<i64: 8, 128>}]} {
    %c0_i32 = arith.constant 0 : i32
    %0 = arith.cmpi eq, %arg1, %c0_i32 : i32
    %1 = arith.extui %0 : i1 to i32
    %c0_i32_0 = arith.constant 0 : i32
    %2 = arith.cmpi ne, %1, %c0_i32_0 : i32
    scf.if %2 {
      %cst_8 = arith.constant 0.000000e+00 : f32
      %12 = vector.broadcast %cst_8 : f32 to vector<8x128xf32>
      %c0_9 = arith.constant 0 : index
      %c0_10 = arith.constant 0 : index
      %13 = vector.load %arg10[%c0_9, %c0_10] : memref<8x128xf32, #tpu.memory_space<vmem>>, vector<8x128xf32>
      tpu.vector_store %arg10[%c0_9, %c0_10], %12 {strides = array<i32>} : memref<8x128xf32, #tpu.memory_space<vmem>>, vector<8x128xf32>,
    } else {
    }
    %c0 = arith.constant 0 : index
    %c0_1 = arith.constant 0 : index
    %3 = vector.load %arg10[%c0, %c0_1] : memref<8x128xf32, #tpu.memory_space<vmem>>, vector<8x128xf32>
    %c0_2 = arith.constant 0 : index
    %c0_3 = arith.constant 0 : index
    %c0_4 = arith.constant 0 : index
    %4 = vector.load %arg2[%c0_2, %c0_3, %c0_4] : memref<8x8x128xbf16, #tpu.memory_space<vmem>>, vector<8x8x128xbf16>
    %5 = arith.extf %4 : vector<8x8x128xbf16> to vector<8x8x128xf32>
    %cst = arith.constant dense<0.000000e+00> : vector<8x128xf32>
    %6 = vector.multi_reduction <add>, %5, %cst [1] : vector<8x8x128xf32> to vector<8x128xf32>
    %7 = arith.addf %3, %6 : vector<8x128xf32>
    %c0_5 = arith.constant 0 : index
    %c0_6 = arith.constant 0 : index
    %8 = vector.load %arg10[%c0_5, %c0_6] : memref<8x128xf32, #tpu.memory_space<vmem>>, vector<8x128xf32>
    tpu.vector_store %arg10[%c0_5, %c0_6], %7 {strides = array<i32>} : memref<8x128xf32, #tpu.memory_space<vmem>>, vector<8x128xf32>,
    %c1_i32 = arith.constant 1 : i32
    %9 = arith.cmpi eq, %arg1, %c1_i32 : i32
    %10 = arith.extui %9 : i1 to i32
    %c0_i32_7 = arith.constant 0 : i32
    %11 = arith.cmpi ne, %10, %c0_i32_7 : i32
    scf.if %11 {
      %c0_8 = arith.constant 0 : index
      %c0_9 = arith.constant 0 : index
      %12 = vector.load %arg10[%c0_8, %c0_9] : memref<8x128xf32, #tpu.memory_space<vmem>>, vector<8x128xf32>
      %c0_10 = arith.constant 0 : index
      %c0_11 = arith.constant 0 : index
      %13 = vector.load %arg3[%c0_10, %c0_11] : memref<128x128xf32, #tpu.memory_space<vmem>>, vector<128x128xf32>
      %cst_12 = arith.constant dense<0.000000e+00> : vector<8x128xf32>
      %14 = tpu.matmul %12, %13, %cst_12 {dimension_numbers = #tpu.dot_dimension_numbers<[1], [0], [0], [1], [0, 0, 1, 1], [], []>} : vector<8x128xf32>, vector<128x128xf32>, vector<8x128xf32> -> vector<8x128xf32>
      %cst_13 = arith.constant 1.562500e-02 : f32
      %15 = vector.broadcast %cst_13 : f32 to vector<8x128xf32>
      %16 = arith.mulf %14, %15 : vector<8x128xf32>
      %c0_14 = arith.constant 0 : index
      %c0_15 = arith.constant 0 : index
      %17 = vector.load %arg4[%c0_14, %c0_15] : memref<1x128xf32, #tpu.memory_space<vmem>>, vector<1x128xf32>
      %18 = vector.broadcast %17 : vector<1x128xf32> to vector<8x128xf32>
      %19 = arith.addf %16, %18 : vector<8x128xf32>
      %c0_16 = arith.constant 0 : index
      %c0_17 = arith.constant 0 : index
      %20 = vector.load %arg8[%c0_16, %c0_17] : memref<8x128xf32, #tpu.memory_space<vmem>>, vector<8x128xf32>
      tpu.vector_store %arg8[%c0_16, %c0_17], %19 {strides = array<i32>} : memref<8x128xf32, #tpu.memory_space<vmem>>, vector<8x128xf32>,
      %21 = tpu.iota {dimensions = array<i32: 1>} : vector<8x128xi32>
      %c24_i32 = arith.constant 24 : i32
      %22 = vector.broadcast %c24_i32 : i32 to vector<8x128xi32>
      %23 = arith.cmpi slt, %21, %22 : vector<8x128xi32>
      %cst_18 = arith.constant 0.000000e+00 : f32
      %24 = vector.broadcast %cst_18 : f32 to vector<8x128xf32>
      %c0_i32_19 = arith.constant 0 : i32
      %25 = vector.broadcast %c0_i32_19 : i32 to vector<8x128xi32>
      %26 = arith.cmpi sge, %21, %25 : vector<8x128xi32>
      %c6_i32 = arith.constant 6 : i32
      %27 = vector.broadcast %c6_i32 : i32 to vector<8x128xi32>
      %28 = arith.cmpi slt, %21, %27 : vector<8x128xi32>
      %29 = arith.andi %26, %28 : vector<8x128xi1>
      %cst_20 = arith.constant -1.000000e+30 : f32
      %30 = vector.broadcast %cst_20 : f32 to vector<8x128xf32>
      %31 = arith.select %29, %19, %30 : vector<8x128xi1>, vector<8x128xf32>
      %cst_21 = arith.constant dense<0xFF800000> : vector<8xf32>
      %32 = vector.multi_reduction <maximumf>, %31, %cst_21 [1] : vector<8x128xf32> to vector<8xf32>
      %33 = vector.shape_cast %32 : vector<8xf32> to vector<8x1xf32>
      %34 = vector.shape_cast %33 : vector<8x1xf32> to vector<8x1xf32>
      %35 = vector.broadcast %34 : vector<8x1xf32> to vector<8x128xf32>
      %36 = arith.select %29, %35, %24 : vector<8x128xi1>, vector<8x128xf32>
      %c6_i32_22 = arith.constant 6 : i32
      %37 = vector.broadcast %c6_i32_22 : i32 to vector<8x128xi32>
      %38 = arith.cmpi sge, %21, %37 : vector<8x128xi32>
      %c9_i32 = arith.constant 9 : i32
      %39 = vector.broadcast %c9_i32 : i32 to vector<8x128xi32>
      %40 = arith.cmpi slt, %21, %39 : vector<8x128xi32>
      %41 = arith.andi %38, %40 : vector<8x128xi1>
      %cst_23 = arith.constant -1.000000e+30 : f32
      %42 = vector.broadcast %cst_23 : f32 to vector<8x128xf32>
      %43 = arith.select %41, %19, %42 : vector<8x128xi1>, vector<8x128xf32>
      %cst_24 = arith.constant dense<0xFF800000> : vector<8xf32>
      %44 = vector.multi_reduction <maximumf>, %43, %cst_24 [1] : vector<8x128xf32> to vector<8xf32>
      %45 = vector.shape_cast %44 : vector<8xf32> to vector<8x1xf32>
      %46 = vector.shape_cast %45 : vector<8x1xf32> to vector<8x1xf32>
      %47 = vector.broadcast %46 : vector<8x1xf32> to vector<8x128xf32>
      %48 = arith.select %41, %47, %36 : vector<8x128xi1>, vector<8x128xf32>
      %c9_i32_25 = arith.constant 9 : i32
      %49 = vector.broadcast %c9_i32_25 : i32 to vector<8x128xi32>
      %50 = arith.cmpi sge, %21, %49 : vector<8x128xi32>
      %c11_i32 = arith.constant 11 : i32
      %51 = vector.broadcast %c11_i32 : i32 to vector<8x128xi32>
      %52 = arith.cmpi slt, %21, %51 : vector<8x128xi32>
      %53 = arith.andi %50, %52 : vector<8x128xi1>
      %cst_26 = arith.constant -1.000000e+30 : f32
      %54 = vector.broadcast %cst_26 : f32 to vector<8x128xf32>
      %55 = arith.select %53, %19, %54 : vector<8x128xi1>, vector<8x128xf32>
      %cst_27 = arith.constant dense<0xFF800000> : vector<8xf32>
      %56 = vector.multi_reduction <maximumf>, %55, %cst_27 [1] : vector<8x128xf32> to vector<8xf32>
      %57 = vector.shape_cast %56 : vector<8xf32> to vector<8x1xf32>
      %58 = vector.shape_cast %57 : vector<8x1xf32> to vector<8x1xf32>
      %59 = vector.broadcast %58 : vector<8x1xf32> to vector<8x128xf32>
      %60 = arith.select %53, %59, %48 : vector<8x128xi1>, vector<8x128xf32>
      %c11_i32_28 = arith.constant 11 : i32
      %61 = vector.broadcast %c11_i32_28 : i32 to vector<8x128xi32>
      %62 = arith.cmpi sge, %21, %61 : vector<8x128xi32>
      %c15_i32 = arith.constant 15 : i32
      %63 = vector.broadcast %c15_i32 : i32 to vector<8x128xi32>
      %64 = arith.cmpi slt, %21, %63 : vector<8x128xi32>
      %65 = arith.andi %62, %64 : vector<8x128xi1>
      %cst_29 = arith.constant -1.000000e+30 : f32
      %66 = vector.broadcast %cst_29 : f32 to vector<8x128xf32>
      %67 = arith.select %65, %19, %66 : vector<8x128xi1>, vector<8x128xf32>
      %cst_30 = arith.constant dense<0xFF800000> : vector<8xf32>
      %68 = vector.multi_reduction <maximumf>, %67, %cst_30 [1] : vector<8x128xf32> to vector<8xf32>
      %69 = vector.shape_cast %68 : vector<8xf32> to vector<8x1xf32>
      %70 = vector.shape_cast %69 : vector<8x1xf32> to vector<8x1xf32>
      %71 = vector.broadcast %70 : vector<8x1xf32> to vector<8x128xf32>
      %72 = arith.select %65, %71, %60 : vector<8x128xi1>, vector<8x128xf32>
      %c15_i32_31 = arith.constant 15 : i32
      %73 = vector.broadcast %c15_i32_31 : i32 to vector<8x128xi32>
      %74 = arith.cmpi sge, %21, %73 : vector<8x128xi32>
      %c22_i32 = arith.constant 22 : i32
      %75 = vector.broadcast %c22_i32 : i32 to vector<8x128xi32>
      %76 = arith.cmpi slt, %21, %75 : vector<8x128xi32>
      %77 = arith.andi %74, %76 : vector<8x128xi1>
      %cst_32 = arith.constant -1.000000e+30 : f32
      %78 = vector.broadcast %cst_32 : f32 to vector<8x128xf32>
      %79 = arith.select %77, %19, %78 : vector<8x128xi1>, vector<8x128xf32>
      %cst_33 = arith.constant dense<0xFF800000> : vector<8xf32>
      %80 = vector.multi_reduction <maximumf>, %79, %cst_33 [1] : vector<8x128xf32> to vector<8xf32>
      %81 = vector.shape_cast %80 : vector<8xf32> to vector<8x1xf32>
      %82 = vector.shape_cast %81 : vector<8x1xf32> to vector<8x1xf32>
      %83 = vector.broadcast %82 : vector<8x1xf32> to vector<8x128xf32>
      %84 = arith.select %77, %83, %72 : vector<8x128xi1>, vector<8x128xf32>
      %c22_i32_34 = arith.constant 22 : i32
      %85 = vector.broadcast %c22_i32_34 : i32 to vector<8x128xi32>
      %86 = arith.cmpi sge, %21, %85 : vector<8x128xi32>
      %c24_i32_35 = arith.constant 24 : i32
      %87 = vector.broadcast %c24_i32_35 : i32 to vector<8x128xi32>
      %88 = arith.cmpi slt, %21, %87 : vector<8x128xi32>
      %89 = arith.andi %86, %88 : vector<8x128xi1>
      %cst_36 = arith.constant -1.000000e+30 : f32
      %90 = vector.broadcast %cst_36 : f32 to vector<8x128xf32>
      %91 = arith.select %89, %19, %90 : vector<8x128xi1>, vector<8x128xf32>
      %cst_37 = arith.constant dense<0xFF800000> : vector<8xf32>
      %92 = vector.multi_reduction <maximumf>, %91, %cst_37 [1] : vector<8x128xf32> to vector<8xf32>
      %93 = vector.shape_cast %92 : vector<8xf32> to vector<8x1xf32>
      %94 = vector.shape_cast %93 : vector<8x1xf32> to vector<8x1xf32>
      %95 = vector.broadcast %94 : vector<8x1xf32> to vector<8x128xf32>
      %96 = arith.select %89, %95, %84 : vector<8x128xi1>, vector<8x128xf32>
      %97 = arith.subf %19, %96 : vector<8x128xf32>
      %cst_38 = arith.constant -1.000000e+30 : f32
      %98 = vector.broadcast %cst_38 : f32 to vector<8x128xf32>
      %99 = arith.select %23, %97, %98 : vector<8x128xi1>, vector<8x128xf32>
      %100 = math.exp %99 : vector<8x128xf32>
      %c0_39 = arith.constant 0 : index
      %c0_40 = arith.constant 0 : index
      %101 = vector.load %arg6[%c0_39, %c0_40] : memref<128x128xf32, #tpu.memory_space<vmem>>, vector<128x128xf32>
      %cst_41 = arith.constant dense<0.000000e+00> : vector<8x128xf32>
      %102 = tpu.matmul %100, %101, %cst_41 {dimension_numbers = #tpu.dot_dimension_numbers<[1], [0], [0], [1], [0, 0, 1, 1], [], []>} : vector<8x128xf32>, vector<128x128xf32>, vector<8x128xf32> -> vector<8x128xf32>
      %cst_42 = arith.constant 1.000000e+00 : f32
      %103 = vector.broadcast %cst_42 : f32 to vector<8x128xf32>
      %104 = arith.select %23, %102, %103 : vector<8x128xi1>, vector<8x128xf32>
      %105 = math.log %104 : vector<8x128xf32>
      %106 = arith.addf %105, %96 : vector<8x128xf32>
      %107 = arith.subf %19, %106 : vector<8x128xf32>
      %108 = arith.divf %100, %104 : vector<8x128xf32>
      %c0_43 = arith.constant 0 : index
      %c0_44 = arith.constant 0 : index
      %109 = vector.load %arg7[%c0_43, %c0_44] : memref<8x128xf32, #tpu.memory_space<vmem>>, vector<8x128xf32>
      %cst_45 = arith.constant 1.000000e+00 : f32
      %110 = vector.broadcast %cst_45 : f32 to vector<8x128xf32>
      %111 = arith.subf %110, %108 : vector<8x128xf32>
      %c0_46 = arith.constant 0 : index
      %c0_47 = arith.constant 0 : index
      %112 = vector.load %arg5[%c0_46, %c0_47] : memref<1x128xf32, #tpu.memory_space<vmem>>, vector<1x128xf32>
      %113 = vector.broadcast %112 : vector<1x128xf32> to vector<8x128xf32>
      %114 = arith.mulf %109, %113 : vector<8x128xf32>
      %cst_48 = arith.constant 0.000000e+00 : f32
      %115 = vector.broadcast %cst_48 : f32 to vector<8x128xf32>
      %116 = arith.subf %115, %107 : vector<8x128xf32>
      %117 = arith.mulf %114, %116 : vector<8x128xf32>
      %118 = arith.mulf %117, %111 : vector<8x128xf32>
      %119 = arith.mulf %118, %111 : vector<8x128xf32>
      %cst_49 = arith.constant dense<0.000000e+00> : vector<128xf32>
      %120 = vector.multi_reduction <add>, %119, %cst_49 [0] : vector<8x128xf32> to vector<128xf32>
      %121 = vector.shape_cast %120 : vector<128xf32> to vector<1x128xf32>
      %cst_50 = arith.constant dense<0.000000e+00> : vector<128xf32>
      %122 = vector.multi_reduction <add>, %109, %cst_50 [0] : vector<8x128xf32> to vector<128xf32>
      %123 = vector.shape_cast %122 : vector<128xf32> to vector<1x128xf32>
      %124 = tpu.iota {dimensions = array<i32: 0>} : vector<8x128xi32>
      %c0_i32_51 = arith.constant 0 : i32
      %125 = vector.broadcast %c0_i32_51 : i32 to vector<8x128xi32>
      %126 = arith.cmpi eq, %124, %125 : vector<8x128xi32>
      %cst_52 = arith.constant 0.000000e+00 : f32
      %127 = vector.shape_cast %121 : vector<1x128xf32> to vector<1x128xf32>
      %128 = vector.broadcast %127 : vector<1x128xf32> to vector<8x128xf32>
      %129 = vector.broadcast %cst_52 : f32 to vector<8x128xf32>
      %130 = arith.select %126, %128, %129 : vector<8x128xi1>, vector<8x128xf32>
      %c1_i32_53 = arith.constant 1 : i32
      %131 = vector.broadcast %c1_i32_53 : i32 to vector<8x128xi32>
      %132 = arith.cmpi eq, %124, %131 : vector<8x128xi32>
      %cst_54 = arith.constant 0.000000e+00 : f32
      %133 = vector.shape_cast %123 : vector<1x128xf32> to vector<1x128xf32>
      %134 = vector.broadcast %133 : vector<1x128xf32> to vector<8x128xf32>
      %135 = vector.broadcast %cst_54 : f32 to vector<8x128xf32>
      %136 = arith.select %132, %134, %135 : vector<8x128xi1>, vector<8x128xf32>
      %137 = arith.addf %130, %136 : vector<8x128xf32>
      %c0_55 = arith.constant 0 : index
      %c0_56 = arith.constant 0 : index
      %138 = vector.load %arg9[%c0_55, %c0_56] : memref<8x128xf32, #tpu.memory_space<vmem>>, vector<8x128xf32>
      tpu.vector_store %arg9[%c0_55, %c0_56], %137 {strides = array<i32>} : memref<8x128xf32, #tpu.memory_space<vmem>>, vector<8x128xf32>,
    } else {
    }
    return
  }
  func.func @transform_0(%arg0: i32, %arg1: i32) -> (i32, i32, i32) {
    %c0_i32 = arith.constant 0 : i32
    %c0_i32_0 = arith.constant 0 : i32
    return %arg0, %arg1, %c0_i32 : i32, i32, i32
  }
  func.func @transform_1(%arg0: i32, %arg1: i32) -> (i32, i32) {
    %c0_i32 = arith.constant 0 : i32
    %c0_i32_0 = arith.constant 0 : i32
    %c0_i32_1 = arith.constant 0 : i32
    return %c0_i32, %c0_i32_0 : i32, i32
  }
  func.func @transform_2(%arg0: i32, %arg1: i32) -> (i32, i32) {
    %c0_i32 = arith.constant 0 : i32
    %c0_i32_0 = arith.constant 0 : i32
    %c0_i32_1 = arith.constant 0 : i32
    return %c0_i32, %c0_i32_0 : i32, i32
  }
  func.func @transform_3(%arg0: i32, %arg1: i32) -> (i32, i32) {
    %c0_i32 = arith.constant 0 : i32
    %c0_i32_0 = arith.constant 0 : i32
    %c0_i32_1 = arith.constant 0 : i32
    return %c0_i32, %c0_i32_0 : i32, i32
  }
  func.func @transform_4(%arg0: i32, %arg1: i32) -> (i32, i32) {
    %c0_i32 = arith.constant 0 : i32
    %c0_i32_0 = arith.constant 0 : i32
    %c0_i32_1 = arith.constant 0 : i32
    return %c0_i32, %c0_i32_0 : i32, i32
  }
  func.func @transform_5(%arg0: i32, %arg1: i32) -> (i32, i32) {
    %c0_i32 = arith.constant 0 : i32
    %c0_i32_0 = arith.constant 0 : i32
    return %arg0, %c0_i32 : i32, i32
  }
  func.func @transform_6(%arg0: i32, %arg1: i32) -> (i32, i32) {
    %c0_i32 = arith.constant 0 : i32
    %c0_i32_0 = arith.constant 0 : i32
    return %arg0, %c0_i32 : i32, i32
  }
  func.func @transform_7(%arg0: i32, %arg1: i32) -> (i32, i32) {
    %c0_i32 = arith.constant 0 : i32
    %c0_i32_0 = arith.constant 0 : i32
    return %arg0, %c0_i32 : i32, i32
  }
}

</mosaic_0001>

<bundles_post_ra>
// kernel: multi_task_forward.1
= control target key start
LH: loop header
LB: loop body
LE: loop exit
PB: predicated region body
PF: predicated region fallthrough
CT: control target
= control target key end

     0   :  { %s1235_s24 = smov 0   ;;  %s1237_s25 = smov 0   ;;  %s1548_s0 = inlined_call_operand.vmem [shape: bf16[16,16,128], index: 0, kind: input, shape index: {}]   ;;  %s1549_s1 = inlined_call_operand.vmem [shape: f32[128,128], index: 1, kind: input, shape index: {}]   ;;  %s1550_s2 = inlined_call_operand.vmem [shape: f32[1,128], index: 2, kind: input, shape index: {}]   ;;  %s1551_s3 = inlined_call_operand.vmem [shape: f32[1,128], index: 3, kind: input, shape index: {}]   ;;  %s1552_s4 = inlined_call_operand.vmem [shape: f32[128,128], index: 4, kind: input, shape index: {}]   ;;  %s1553_s5 = inlined_call_operand.vmem [shape: f32[16,128], index: 5, kind: input, shape index: {}]   ;;  %s1554_s6 = inlined_call_operand.vmem [shape: f32[16,128], index: 6, kind: output, shape index: {0}]   ;;  %s1555_s7 = inlined_call_operand.vmem [shape: f32[16,128], index: 7, kind: output, shape index: {1}]  }
   0x1   :  { %s1239_s26 = smov 0   ;;  %s1241_s27 = smov 0  }
   0x2   :  { %s1243_s28 = smov 0   ;;  %s1245_s29 = smov 0  }
   0x3   :  { %s1247_s30 = smov 0  }
   0x4 LB: > { %s27_s8 = sadd.s32 1, %s1181_s28  ;;  %s30_s9 = sadd.s32 1, %s1185_s29  ;;  %s1189_s30 = sphi %s1247_s30, %s18_s30   ;;  %s1185_s29 = sphi %s1245_s29, %s1571_s29   ;;  %s1181_s28 = sphi %s1243_s28, %s1570_s28   ;;  %s1177_s27 = sphi %s1241_s27, %s1569_s27   ;;  %s1173_s26 = sphi %s1239_s26, %s1568_s26   ;;  %s1169_s25 = sphi %s1237_s25, %s1567_s25   ;;  %s1165_s24 = sphi %s1235_s24, %s1566_s24  }
   0x5   : > { %p28_p0 = scmp.ge.s32.totalorder %s27_s8, 2  ;;  %p46_p1 = scmp.ne.s32.totalorder %s1169_s25, %s1165_s24 }
   0x6   : > { %p47_p2 = scmp.eq.s32.totalorder %s1189_s30, 0  ;;  %s39_s13 = sadd.s32 1, %s1169_s25 }
   0x7   : > { %s1573_s8 = smov (%p28_p0, %s27_s8), 0  ;;  %s1575_s9 = smov (!%p28_p0, %s30_s9), %s1185_s29 }
   0x8   : > { %p48_p3 = por %p47_p2, %p46_p1  ;;  %p32_p4 = scmp.ge.s32.totalorder %s1575_s9, 2 }
   0x9   : > { %s35_s10 = ssub.s32 %s1181_s28, %s1573_s8  ;;  %p881_p6 = scmp.ge.s32.totalorder %s1189_s30, 4 }
   0xa   : > { %s1577_s9 = smov (%p32_p4, %s1575_s9), 0 }
   0xb   : > { %s34_s11 = ssub.s32 %s1185_s29, %s1577_s9  ;;  %246 = sbr.rel (%p881_p6) target bundleno = 29 (0x1d), region = 32 }
   0xc   : > { %s36_s12 = sor.u32 %s35_s10, %s34_s11 }
   0xd   : > { %p37_p5 = scmp.eq.s32.totalorder %s36_s12, 0 }
   0xf   : > { %s1286_s14 = scalar_select %p37_p5, %s1169_s25, %s39_s13  }
  0x12   : > { %249 = sbr.rel (!%p48_p3) target bundleno = 29 (0x1d), region = 36  ;;  %s251_s15 = sand.u32 (%p48_p3), 1, %s1169_s25  }
  0x13   : > { %s897_s16 = sshll.u32 (%p48_p3), %s1185_s29, 4  ;;  %s882_s17 = sshll.u32 (%p48_p3), %s251_s15, 5 }
  0x14   : > { %s256_s18 = sadd.s32 (%p48_p3), %s1181_s28, %s897_s16  ;;  %s253_s23 = scalar_lea.vmem (%p48_p3), [#allocation3], %s882_s17 }
  0x15   : > { %s885_s19 = sshll.u32 (%p48_p3), %s256_s18, 2 }
  0x16   : > { %s258_s22 = scalar_lea.vmem (%p48_p3), %s1548_s0, %s885_s19 }
  0x17   : > { %v274_v0 = vld [vmem:[%s258_s22] sm:$0xf] (%p48_p3)  ;;  %v276_v1 = vld [vmem:[%s258_s22 + $0x8] sm:$0xf] (%p48_p3)  ;;  %v278_v2 = vld [vmem:[%s258_s22 + $0x10] sm:$0xf] (%p48_p3) }
  0x18   : > { %275 = vst [vmem:[%s253_s23] sm:$0xf] (%p48_p3), %v274_v0  ;;  %277 = vst [vmem:[%s253_s23 + $0x4] sm:$0xf] (%p48_p3), %v276_v1  ;;  %v280_v3 = vld [vmem:[%s258_s22 + $0x18] sm:$0xf] (%p48_p3) }
  0x19   : > { %279 = vst [vmem:[%s253_s23 + $0x8] sm:$0xf] %v278_v2  ;;  %v282_v4 = vld [vmem:[%s258_s22 + $0x20] sm:$0xf]  ;;  %v284_v5 = vld [vmem:[%s258_s22 + $0x28] sm:$0xf] }
  0x1a   : > { %281 = vst [vmem:[%s253_s23 + $0xc] sm:$0xf] %v280_v3  ;;  %283 = vst [vmem:[%s253_s23 + $0x10] sm:$0xf] %v282_v4  ;;  %v286_v6 = vld [vmem:[%s258_s22 + $0x30] sm:$0xf] }
  0x1b   : > { %285 = vst [vmem:[%s253_s23 + $0x14] sm:$0xf] %v284_v5  ;;  %v288_v7 = vld [vmem:[%s258_s22 + $0x38] sm:$0xf]  ;;  %287 = vst [vmem:[%s253_s23 + $0x18] sm:$0xf] %v286_v6 }
  0x1c   : > { %289 = vst [vmem:[%s253_s23 + $0x1c] sm:$0xf] %v288_v7 }
  0x1d PF: > { %p886_p7 = scmp.ge.s32.totalorder %s1189_s30, 1  ;;  %p334_p8 = scmp.lt.s32.totalorder %s1189_s30, 5 }
  0x1f   : > { %p335_p9 = pnand %p886_p7, %p334_p8 }
  0x20   : > { %s341_s10 = sand.u32 (!%p335_p9), 1, %s1165_s24   ;;  %p380_p10 = scmp.lt.s32.totalorder (!%p335_p9), %s1177_s27, 1 }
  0x21   : > { %338 = sbr.rel (%p335_p9) target bundleno = 736 (0x2e0), region = 81  ;;  %s887_s11 = sshll.u32 (!%p335_p9), %s341_s10, 5 }
  0x22   : > { %s343_s22 = scalar_lea.vmem (!%p335_p9), [#allocation3], %s887_s11  ;;  %p891_p11 = scmp.ne.s32.totalorder (!%p335_p9), %s1173_s26, 0 }
  0x28   : > { %s1579_s27 = smov (!%p380_p10, %s1177_s27), 1  ;;  %395 = sbr.rel (%p891_p11) target bundleno = 47 (0x2f), region = 89 }
  0x29   : > { %s1300_s12 = sshll.u32 %s1579_s27, 3  ;;  %v1191_v8 = vmov (!%p891_p11), 0.0  }
  0x2a   : > { %s383_s16 = scalar_lea.vmem %s1553_s5, %s1300_s12  ;;  %s387_s19 = scalar_lea.vmem %s1554_s6, %s1300_s12  ;;  %396 = vst [vmem:[#allocation2] sm:$0xff] (!%p891_p11), %v1191_v8 }
  0x2b   : > { %s391_s24 = scalar_lea.vmem %s1555_s7, %s1300_s12 }
  0x2f PF: > { %v899_v9 = vld [vmem:[%s343_s22] sm:$0xff]   ;;  %v914_v10 = vld [vmem:[%s343_s22 + $0x8] sm:$0xff]   ;;  %v915_v15 = vld [vmem:[%s343_s22 + $0x10] sm:$0xff]   ;;  %vm470_vm0 = vcmask 1041409   ;;  %vm472_vm1 = vcmask 1042434   ;;  %vm474_vm2 = vcmask 1043459  }
  0x30   : > { %v900_v11 = vunpack.c.l.bf16 %v899_v9  ;;  %v901_v12 = vunpack.c.h.bf16 %v899_v9  ;;  %v904_v13 = vunpack.c.l.bf16 %v914_v10  ;;  %v905_v14 = vunpack.c.h.bf16 %v914_v10  ;;  %v916_v16 = vld [vmem:[%s343_s22 + $0x18] sm:$0xff]   ;;  %p892_p12 = scmp.ne.s32.totalorder %s1173_s26, 1 }
  0x31   : > { %v908_v17 = vunpack.c.l.bf16 %v915_v15  ;;  %v909_v18 = vunpack.c.h.bf16 %v915_v15  ;;  %v912_v19 = vunpack.c.l.bf16 %v916_v16  ;;  %v913_v20 = vunpack.c.h.bf16 %v916_v16  ;;  %v397_v9 = vld [vmem:[#allocation2] sm:$0xff]  ;;  %v493_v15 = vld [vmem:[%s1549_s1 + $0x8] sm:$0xff] (!%p892_p12)  ;;  %v494_v16 = vld [vmem:[%s1549_s1 + $0x10] sm:$0xff] (!%p892_p12) }
  0x32   : > { %v414_v21 = vrot.slane %v900_v11, 4  ;;  %v420_v22 = vrot.slane %v901_v12, 4  ;;  %v426_v23 = vrot.slane %v904_v13, 4  ;;  %v432_v24 = vrot.slane %v905_v14, 4 }
  0x33   : > { %v438_v25 = vrot.slane %v908_v17, 4  ;;  %v444_v26 = vrot.slane %v909_v18, 4  ;;  %v450_v27 = vrot.slane %v912_v19, 4  ;;  %v456_v28 = vrot.slane %v913_v20, 4 }
  0x34   : > { %v415_v29 = vadd.f32 %v900_v11, %v414_v21  ;;  %v421_v30 = vadd.f32 %v901_v12, %v420_v22  ;;  %v427_v31 = vadd.f32 %v904_v13, %v426_v23  ;;  %v433_v32 = vadd.f32 %v905_v14, %v432_v24  ;;  %v492_v14 = vld [vmem:[%s1549_s1] sm:$0xff] (!%p892_p12)  ;;  %v497_v23 = vld [vmem:[%s1549_s1 + $0x28] sm:$0xff] (!%p892_p12) }
  0x35   : > { %v439_v33 = vadd.f32 %v908_v17, %v438_v25  ;;  %v445_v34 = vadd.f32 %v909_v18, %v444_v26  ;;  %v451_v35 = vadd.f32 %v912_v19, %v450_v27  ;;  %v457_v36 = vadd.f32 %v913_v20, %v456_v28  ;;  %v495_v19 = vld [vmem:[%s1549_s1 + $0x18] sm:$0xff] (!%p892_p12)  ;;  %v496_v22 = vld [vmem:[%s1549_s1 + $0x20] sm:$0xff] (!%p892_p12)  ;;  %v498_v25 = vld [vmem:[%s1549_s1 + $0x30] sm:$0xff] (!%p892_p12) }
  0x36   : > { %v416_v37 = vrot.slane %v415_v29, 2  ;;  %v422_v38 = vrot.slane %v421_v30, 2  ;;  %v428_v39 = vrot.slane %v427_v31, 2  ;;  %v434_v40 = vrot.slane %v433_v32, 2  ;;  %v499_v26 = vld [vmem:[%s1549_s1 + $0x38] sm:$0xff] (!%p892_p12)  ;;  %v500_v28 = vld [vmem:[%s1549_s1 + $0x40] sm:$0xff] (!%p892_p12) }
  0x37   : > { %v440_v41 = vrot.slane %v439_v33, 2  ;;  %v446_v42 = vrot.slane %v445_v34, 2  ;;  %v452_v43 = vrot.slane %v451_v35, 2  ;;  %v458_v44 = vrot.slane %v457_v36, 2 }
  0x38   : > { %v417_v45 = vadd.f32 %v416_v37, %v415_v29  ;;  %v423_v46 = vadd.f32 %v422_v38, %v421_v30  ;;  %v429_v47 = vadd.f32 %v428_v39, %v427_v31  ;;  %v435_v48 = vadd.f32 %v434_v40, %v433_v32  ;;  %v501_v29 = vld [vmem:[%s1549_s1 + $0x48] sm:$0xff] (!%p892_p12)  ;;  %v502_v31 = vld [vmem:[%s1549_s1 + $0x50] sm:$0xff] (!%p892_p12)  ;;  %v503_v32 = vld [vmem:[%s1549_s1 + $0x58] sm:$0xff] (!%p892_p12) }
  0x39   : > { %v441_v49 = vadd.f32 %v440_v41, %v439_v33  ;;  %v447_v50 = vadd.f32 %v446_v42, %v445_v34  ;;  %v453_v51 = vadd.f32 %v452_v43, %v451_v35  ;;  %v459_v52 = vadd.f32 %v458_v44, %v457_v36  ;;  %v504_v34 = vld [vmem:[%s1549_s1 + $0x60] sm:$0xff] (!%p892_p12)  ;;  %v505_v35 = vld [vmem:[%s1549_s1 + $0x68] sm:$0xff] (!%p892_p12)  ;;  %v506_v37 = vld [vmem:[%s1549_s1 + $0x70] sm:$0xff] (!%p892_p12) }
  0x3a   : > { %v418_v53 = vrot.slane %v417_v45, 1  ;;  %v424_v54 = vrot.slane %v423_v46, 1  ;;  %v430_v55 = vrot.slane %v429_v47, 1  ;;  %v436_v56 = vrot.slane %v435_v48, 1  ;;  %v507_v38 = vld [vmem:[%s1549_s1 + $0x78] sm:$0xff] (!%p892_p12)  ;;  %v636_v41 = vld [vmem:[%s1552_s4] sm:$0xff] (!%p892_p12) }
  0x3b   : > { %v442_v57 = vrot.slane %v441_v49, 1  ;;  %v448_v58 = vrot.slane %v447_v50, 1  ;;  %v454_v59 = vrot.slane %v453_v51, 1  ;;  %v460_v60 = vrot.slane %v459_v52, 1  ;;  %v637_v42 = vld [vmem:[%s1552_s4 + $0x8] sm:$0xff] (!%p892_p12)  ;;  %v638_v43 = vld [vmem:[%s1552_s4 + $0x10] sm:$0xff] (!%p892_p12) }
  0x3c   : > { %v419_v61 = vadd.f32 %v418_v53, %v417_v45  ;;  %v425_v62 = vadd.f32 %v424_v54, %v423_v46  ;;  %v431_v63 = vadd.f32 %v430_v55, %v429_v47  ;;  %v437_v0 = vadd.f32 %v436_v56, %v435_v48  ;;  %v639_v45 = vld [vmem:[%s1552_s4 + $0x18] sm:$0xff] (!%p892_p12) }
  0x3d   : > { %v443_v1 = vadd.f32 %v442_v57, %v441_v49  ;;  %v449_v2 = vadd.f32 %v448_v58, %v447_v50  ;;  %vm476_vm3 = vcmask 1044484   ;;  %v455_v4 = vadd.f32 %v454_v59, %v453_v51  ;;  %v893_v50 = vld [vmem:[%s1550_s2] ss:$0 sm:$0xff] (!%p892_p12) }
  0x3e   : > { %v471_v3 = vsel %vm470_vm0, %v425_v62, %v419_v61  ;;  %vm478_vm4 = vcmask 1045509   ;;  %v461_v6 = vadd.f32 %v460_v60, %v459_v52  ;;  %vm480_vm5 = vcmask 1046534  }
  0x3f   : > { %v473_v5 = vsel %vm472_vm1, %v431_v63, %v471_v3  ;;  %vm482_vm6 = vcmask 1047559   ;;  %v1192_v17 = vmov (!%p892_p12), 0.0|0.0   ;;  %v1022_v18 = vpack.c.bf16 (!%p892_p12), %v493_v15, %v492_v14  ;;  %v649_v14 = vld [vmem:[%s1552_s4 + $0x68] sm:$0xff] (!%p892_p12) }
  0x40   : > { %v475_v7 = vsel %vm474_vm2, %v437_v0, %v473_v5  ;;  %1021 = vmatprep.subr.bf16.mxu0 (!%p892_p12), %v1192_v17  ;;  %vm1193_vm7 = vmmov (!%p892_p12), 0   ;;  %v1194_v20 = vmov (!%p892_p12), 0.0   ;;  %1045 = vmatprep.subr.bf16.mxu1 (!%p892_p12), %v1192_v17  ;;  %v1025_v21 = vpack.c.bf16 (!%p892_p12), %v495_v19, %v494_v16  ;;  %v643_v5 = vld [vmem:[%s1552_s4 + $0x38] sm:$0xff] (!%p892_p12)  ;;  %v650_v16 = vld [vmem:[%s1552_s4 + $0x70] sm:$0xff] (!%p892_p12) }
  0x41   : > { %v477_v8 = vsel %vm476_vm3, %v443_v1, %v475_v7  ;;  %490 = sbr.rel (%p892_p12) target bundleno = 736 (0x2e0), region = 93  ;;  %983 = vmatprep.mubr.msk.f32.mxu0 (!%p892_p12), %vm1193_vm7, %v1194_v20  ;;  %1018 = vmatprep.mubr.msk.f32.mxu1 (!%p892_p12), %vm1193_vm7, %v1194_v20  ;;  %v1028_v24 = vpack.c.bf16 (!%p892_p12), %v497_v23, %v496_v22  ;;  %v1031_v27 = vpack.c.bf16 (!%p892_p12), %v499_v26, %v498_v25  ;;  %v588_v47 = vlaneseq (!%p892_p12)  ;;  %v640_v1 = vld [vmem:[%s1552_s4 + $0x20] sm:$0xff] (!%p892_p12) }
  0x42   : > { %v479_v10 = vsel %vm478_vm4, %v449_v2, %v477_v8  ;;  %1023 = vmatpush3.bf16.msra.mxu0 (!%p892_p12), %v1022_v18  ;;  %v1034_v30 = vpack.c.bf16 (!%p892_p12), %v501_v29, %v500_v28  ;;  %v1037_v33 = vpack.c.bf16 (!%p892_p12), %v503_v32, %v502_v31  ;;  %v1040_v36 = vpack.c.bf16 (!%p892_p12), %v505_v35, %v504_v34  ;;  %v641_v2 = vld [vmem:[%s1552_s4 + $0x28] sm:$0xff] (!%p892_p12)  ;;  %v644_v7 = vld [vmem:[%s1552_s4 + $0x40] sm:$0xff] (!%p892_p12)  ;;  %v651_v18 = vld [vmem:[%s1552_s4 + $0x78] sm:$0xff] (!%p892_p12) }
  0x43   : > { %v481_v11 = vsel %vm480_vm5, %v455_v4, %v479_v10  ;;  %1024 = vmatprep.subr.bf16.mxu0 (!%p892_p12), %v1192_v17  ;;  %v1043_v39 = vpack.c.bf16 (!%p892_p12), %v507_v38, %v506_v37  ;;  %v1046_v44 = vpack.c.bf16 (!%p892_p12), %v637_v42, %v636_v41  ;;  %v1049_v46 = vpack.c.bf16 (!%p892_p12), %v639_v45, %v638_v43  ;;  %v642_v4 = vld [vmem:[%s1552_s4 + $0x30] sm:$0xff] (!%p892_p12)  ;;  %v645_v8 = vld [vmem:[%s1552_s4 + $0x48] sm:$0xff] (!%p892_p12)  ;;  %v894_v43 = vld [vmem:[%s1551_s3] ss:$0 sm:$0xff] (!%p892_p12) }
  0x44   : > { %v483_v12 = vsel %vm482_vm6, %v461_v6, %v481_v11  ;;  %v1390_v48 = vand.u32 (!%p892_p12), 127, %v588_v47  ;;  %v1052_v3 = vpack.c.bf16 (!%p892_p12), %v641_v2, %v640_v1  ;;  %v1055_v6 = vpack.c.bf16 (!%p892_p12), %v643_v5, %v642_v4  ;;  %v646_v10 = vld [vmem:[%s1552_s4 + $0x50] sm:$0xff] (!%p892_p12)  ;;  %v647_v11 = vld [vmem:[%s1552_s4 + $0x58] sm:$0xff] (!%p892_p12) }
  0x45   : > { %v485_v13 = vadd.f32 %v483_v12, %v397_v9  ;;  %1047 = vmatpush3.bf16.msra.mxu1 (!%p892_p12), %v1046_v44  ;;  %v1058_v9 = vpack.c.bf16 (!%p892_p12), %v645_v8, %v644_v7  ;;  %v1061_v12 = vpack.c.bf16 (!%p892_p12), %v647_v11, %v646_v10  ;;  %v1067_v19 = vpack.c.bf16 (!%p892_p12), %v651_v18, %v650_v16 }
  0x46   : > { %1026 = vmatpush3.bf16.msra.mxu0 (!%p892_p12), %v1025_v21  ;;  %1048 = vmatprep.subr.bf16.mxu1 (!%p892_p12), %v1192_v17  ;;  %vm605_vm8 = vcmp.ge.s32.totalorder (!%p892_p12), %v1390_v48, 9  ;;  %vm606_vm9 = vcmp.lt.s32.totalorder (!%p892_p12), %v1390_v48, 11  ;;  %vm592_vm11 = vcmp.lt.s32.totalorder (!%p892_p12), %v1390_v48, 6  ;;  %vm612_vm12 = vcmp.ge.s32.totalorder (!%p892_p12), %v1390_v48, 11 }
  0x47   : > { %486 = vst [vmem:[#allocation2] sm:$0xff] %v485_v13  ;;  %1027 = vmatprep.subr.bf16.mxu0 (!%p892_p12), %v1192_v17  ;;  %vm1397_vm10 = vmand (!%p892_p12), %vm605_vm8, %vm606_vm9  ;;  %vm613_vm13 = vcmp.lt.s32.totalorder (!%p892_p12), %v1390_v48, 15  ;;  %vm598_vm14 = vcmp.ge.s32.totalorder (!%p892_p12), %v1390_v48, 6  ;;  %vm599_vm15 = vcmp.lt.s32.totalorder (!%p892_p12), %v1390_v48, 9  ;;  %vm590_vm2 = vcmp.lt.s32.totalorder (!%p892_p12), %v1390_v48, 24  ;;  %v648_v13 = vld [vmem:[%s1552_s4 + $0x60] sm:$0xff] (!%p892_p12) }
  0x48   : > { %vm1420_vm0 = vmand %vm612_vm12, %vm613_vm13  ;;  %vm626_vm3 = vcmp.ge.s32.totalorder %v1390_v48, 22  ;;  %vm619_vm4 = vcmp.ge.s32.totalorder %v1390_v48, 15  ;;  %vm620_vm5 = vcmp.lt.s32.totalorder %v1390_v48, 22  ;;  %v1064_v15 = vpack.c.bf16 %v649_v14, %v648_v13 }
  0x49   : > { %1050 = vmatpush3.bf16.msra.mxu1 %v1049_v46  ;;  %vm1424_vm1 = vmand %vm598_vm14, %vm599_vm15  ;;  %v756_v61 = vshrl.u32 %v588_v47, 7 }
  0x4a   : > { %1029 = vmatpush3.bf16.msra.mxu0 %v1028_v24  ;;  %1051 = vmatprep.subr.bf16.mxu1 %v1192_v17  ;;  %vm1440_vm6 = vmand %vm626_vm3, %vm590_vm2 }
  0x4b   : > { %1030 = vmatprep.subr.bf16.mxu0 %v1192_v17  ;;  %vm1444_vm7 = vmand %vm619_vm4, %vm620_vm5  ;;  %vm759_vm8 = vcmp.eq.s32.totalorder %v756_v61, 1  ;;  %vm757_vm9 = vcmp.eq.s32.totalorder %v756_v61, 0 }
  0x4d   : > { %1053 = vmatpush3.bf16.msra.mxu1 %v1052_v3 }
  0x4e   : > { %1032 = vmatpush3.bf16.msra.mxu0 %v1031_v27  ;;  %v491_v40 = vld [vmem:[#allocation2] sm:$0xff]  ;;  %1054 = vmatprep.subr.bf16.mxu1 %v1192_v17 }
  0x4f   : > { %1033 = vmatprep.subr.bf16.mxu0 %v1192_v17 }
  0x51   : > { %1056 = vmatpush3.bf16.msra.mxu1 %v1055_v6 }
  0x52   : > { %1035 = vmatpush3.bf16.msra.mxu0 %v1034_v30  ;;  %1057 = vmatprep.subr.bf16.mxu1 %v1192_v17 }
  0x53   : > { %1036 = vmatprep.subr.bf16.mxu0 %v1192_v17 }
  0x55   : > { %1059 = vmatpush3.bf16.msra.mxu1 %v1058_v9 }
  0x56   : > { %1038 = vmatpush3.bf16.msra.mxu0 %v1037_v33  ;;  %1060 = vmatprep.subr.bf16.mxu1 %v1192_v17 }
  0x57   : > { %1039 = vmatprep.subr.bf16.mxu0 %v1192_v17 }
  0x59   : > { %1062 = vmatpush3.bf16.msra.mxu1 %v1061_v12 }
  0x5a   : > { %1041 = vmatpush3.bf16.msra.mxu0 %v1040_v36  ;;  %1063 = vmatprep.subr.bf16.mxu1 %v1192_v17 }
  0x5b   : > { %1042 = vmatprep.subr.bf16.mxu0 %v1192_v17 }
  0x5d   : > { %1065 = vmatpush3.bf16.msra.mxu1 %v1064_v15 }
  0x5e   : > { %1044 = vmatpush3.bf16.msra.mxu0 %v1043_v39  ;;  %1066 = vmatprep.subr.bf16.mxu1 %v1192_v17  ;;  %v729_v39 = vld [vmem:[%s383_s16] sm:$0xff] }
  0x5f   : > { %v749_v41 = vrot.slane %v729_v39, 4  ;;  %v738_v48 = vmul.f32 %v894_v43, %v729_v39 }
  0x61   : > { %984 = vmatmul.mubr.f32.vlgmr.msra.gmra.mrb[0].mxu0 %v491_v40  ;;  %1068 = vmatpush3.bf16.msra.mxu1 %v1067_v19 }
 0x134   : > { %v574_v49 = vpop.f32.mrb[0].mxu0 }
 0x135   : > { %v578_v51 = vmul.f32 0.015625, %v574_v49  ;;  %v985_v52 = vpop.f32.mrb[1].mxu0  ;;  %v750_v49 = vadd.f32 %v749_v41, %v729_v39 }
 0x137   : > { %v1404_v54 = vadd.f32 %v893_v50, %v578_v51  ;;  %v751_v53 = vrot.slane %v750_v49, 2 }
 0x139   : > { %587 = vst [vmem:[%s387_s19] sm:$0xff] %v1404_v54  ;;  %v608_v55 = vsel %vm1397_vm10, %v1404_v54, -1e+30  ;;  %v594_v56 = vsel %vm592_vm11, %v1404_v54, -1e+30  ;;  %v615_v59 = vsel %vm1420_vm0, %v1404_v54, -1e+30  ;;  %v752_v57 = vadd.f32 %v751_v53, %v750_v49 }
 0x13a   : > { %609 = vmax.xlane.f32.xlu1 %v608_v55  ;;  %595 = vmax.xlane.f32.xlu0 %v594_v56  ;;  %v601_v60 = vsel %vm1424_vm1, %v1404_v54, -1e+30  ;;  %v628_v63 = vsel %vm1440_vm6, %v1404_v54, -1e+30  ;;  %v622_v0 = vsel %vm1444_vm7, %v1404_v54, -1e+30 }
 0x13e   : > { %616 = vmax.xlane.f32.xlu1 %v615_v59  ;;  %602 = vmax.xlane.f32.xlu0 %v601_v60  ;;  %v753_v60 = vrot.slane %v752_v57, 1 }
 0x142   : > { %629 = vmax.xlane.f32.xlu1 %v628_v63  ;;  %623 = vmax.xlane.f32.xlu0 %v622_v0  ;;  %v754_v0 = vadd.f32 %v753_v60, %v752_v57 }
 0x144   : > { %v760_v2 = vsel %vm759_vm8, %v754_v0, 0.0 }
 0x1c7   : > { %v610_v20 = vpop.xlane.xlu1 %609  ;;  %v596_v21 = vpop.xlane.xlu0 %595 }
 0x1c8   : > { %v597_v22 = vsel %vm592_vm11, %v596_v21, 0.0 }
 0x1cb   : > { %v617_v23 = vpop.xlane.xlu1 %616  ;;  %v603_v24 = vpop.xlane.xlu0 %602 }
 0x1cc   : > { %v604_v25 = vsel %vm1424_vm1, %v603_v24, %v597_v22 }
 0x1cd   : > { %v611_v26 = vsel %vm1397_vm10, %v610_v20, %v604_v25 }
 0x1ce   : > { %v618_v27 = vsel %vm1420_vm0, %v617_v23, %v611_v26 }
 0x1cf   : > { %v630_v28 = vpop.xlane.xlu1 %629  ;;  %v624_v17 = vpop.xlane.xlu0 %623 }
 0x1d0   : > { %v625_v29 = vsel %vm1444_vm7, %v624_v17, %v618_v27 }
 0x1d1   : > { %v631_v30 = vsel %vm1440_vm6, %v630_v28, %v625_v29 }
 0x1d2   : > { %v632_v31 = vsub.f32 %v1404_v54, %v631_v30 }
 0x1d4   : > { %v633_v32 = vsel %vm590_vm2, %v632_v31, -1e+30 }
 0x1d5   : > { %v634_v33 = vmul.f32 1.442695, %v633_v32 }
 0x1d7   : > { %1129 = vpow2.f32 %v634_v33 }
 0x1e1   : > { %v1130_v34 = vpop.eup %1129 }
 0x1e2   : > { %1019 = vmatmul.mubr.f32.vlgmr.msra.gmra.mrb[0].mxu1 %v1130_v34 }
 0x2b5   : > { %v718_v35 = vpop.f32.mrb[0].mxu1 }
 0x2b6   : > { %v722_v36 = vsel %vm590_vm2, %v718_v35, 1.0  ;;  %v1020_v37 = vpop.f32.mrb[1].mxu1 }
 0x2b7   : > { %1131 = vlog2.f32 %v722_v36 }
 0x2b8   : > { %1133 = vrcp.f32 %v722_v36 }
 0x2c1   : > { %v1132_v38 = vpop.eup %1131 }
 0x2c2   : > { %v724_v40 = vmul.f32 0.6931472, %v1132_v38  ;;  %v1134_v42 = vpop.eup %1133 }
 0x2c3   : > { %v728_v46 = vmul.f32 %v1134_v42, %v1130_v34 }
 0x2c4   : > { %v725_v44 = vadd.f32 %v724_v40, %v631_v30 }
 0x2c5   : > { %v730_v51 = vsub.f32 1.0, %v728_v46 }
 0x2c6   : > { %v726_v45 = vsub.f32 %v1404_v54, %v725_v44 }
 0x2c8   : > { %v739_v50 = vsub.f32 0.0, %v726_v45 }
 0x2ca   : > { %v740_v52 = vmul.f32 %v739_v50, %v738_v48 }
 0x2cc   : > { %v741_v55 = vmul.f32 %v740_v52, %v730_v51 }
 0x2ce   : > { %v742_v56 = vmul.f32 %v741_v55, %v730_v51 }
 0x2d0   : > { %v743_v58 = vrot.slane %v742_v56, 4 }
 0x2d2   : > { %v744_v59 = vadd.f32 %v743_v58, %v742_v56 }
 0x2d4   : > { %v745_v62 = vrot.slane %v744_v59, 2 }
 0x2d6   : > { %v746_v63 = vadd.f32 %v745_v62, %v744_v59 }
 0x2d8   : > { %v747_v54 = vrot.slane %v746_v63, 1 }
 0x2da   : > { %v748_v1 = vadd.f32 %v747_v54, %v746_v63 }
 0x2dc   : > { %v758_v3 = vsel %vm757_vm9, %v748_v1, 0.0 }
 0x2dd   : > { %v761_v4 = vadd.f32 %v760_v2, %v758_v3 }
 0x2df   : > { %762 = vst [vmem:[%s391_s24] sm:$0xff] %v761_v4 }
 0x2e0 PF: > { %s18_s30 = sadd.s32 1, %s1189_s30   ;;  %s1566_s24 = smov %s1169_s25 }
 0x2e1   : > { %p15_p13 = scmp.ge.s32.totalorder %s18_s30, 6   ;;  %s1567_s25 = smov %s1286_s14 }
 0x2e2   : > { %s1568_s26 = smov %s1181_s28  ;;  %s1569_s27 = smov %s1185_s29 }
 0x2e3   : > { %s1570_s28 = smov %s1573_s8  ;;  %s1571_s29 = smov %s1577_s9 }
 0x2e4   :  { %17 = sbr.rel (!%p15_p13) target bundleno = 4 (0x4), region = 143 }

</bundles_post_ra>
